<compile_context>
chip_gen: v5e
topology: v5e:2x2
jax: 0.10.0
libtpu: 0.0.40
codegen_flags: <defaults>
</compile_context>

<pallas_src>
import functools

import jax
import jax.numpy as jnp
from jax.experimental import pallas as pl
from jax.experimental.pallas import tpu as pltpu


def _focal_kernel(bidx_ref, nvb_ref, x_ref, gt_ref, valid_ref, out_ref,
                  acc_ref, cls_ref, *, gamma, select_in_bf16):
    """One grid step = one data-dependently selected block of F frames.

    Grid: (2, NBH)  -- axis 0 = core-parallel partial sums, axis 1 = frame blocks.
    bidx_ref  : SMEM (2, NBH) int32  per-core compacted valid-block indices (prefetch)
    nvb_ref   : SMEM (2,)     int32  per-core number of valid blocks (prefetch)
    x_ref     : VMEM (F, S, P)       log-probabilities (native dtype, f32 or bf16)
    gt_ref    : VMEM (F, 1, P) i32   target slot id per pixel
    valid_ref : VMEM (1, F, 1) i32   per-frame label!=0 mask
    out_ref   : VMEM (1, 1, 1) f32   this core's partial sum
    acc_ref   : VMEM (F, P)    f32   lane-wise running accumulator (scratch)
    cls_ref   : VMEM (S, P)    i32   slot-index slab (scratch, filled once per pass)
    """
    core = pl.program_id(0)          # megacore-parallel axis
    step = pl.program_id(1)          # frame-block (reduction) axis

    @pl.when(step == 0)
    def _init():
        acc_ref[...] = jnp.zeros_like(acc_ref)
        out_ref[...] = jnp.zeros_like(out_ref)
        # Slot-index slab reused every step (vld instead of regenerating iota).
        cls_ref[...] = jax.lax.broadcasted_iota(jnp.int32, cls_ref.shape, 0)

    # Padded grid steps (step >= this core's valid-block count) repeat the
    # previous block index, so their DMA is never re-issued; skip their compute.
    @pl.when(step < nvb_ref[core])
    def _compute():
        x = x_ref[...]                               # (F, S, P) native dtype
        gt = gt_ref[...].astype(jnp.int32)           # (F, 1, P)
        cls = cls_ref[...]                           # (S, P) int32
        sel = cls[None, :, :] == gt                  # (F, S, P) bool

        # Gather logpt[f, p] = x[f, gt[f, p], p] via compare + select + sum over
        # the slot (sublane) axis -- exactly one term per pixel is non-zero.
        if select_in_bf16:
            # bf16-native select/sum (exact); upcast only the (F, P) result.
            zero = jnp.array(0, dtype=x.dtype)
            logpt = jnp.sum(jnp.where(sel, x, zero), axis=1).astype(jnp.float32)
        else:
            logpt = jnp.sum(jnp.where(sel, x.astype(jnp.float32), 0.0), axis=1)

        # Per-frame label mask: masked frame -> logpt = 0 -> pt = 1 -> loss = 0.
        vm = valid_ref[...][0] != 0                  # (F, 1) bool
        logpt = jnp.where(vm, logpt, 0.0)            # (F, P)

        pt = jnp.exp(logpt)
        if isinstance(gamma, int):
            focal = jax.lax.integer_pow(1.0 - pt, gamma)     # VPU-only, safe at pt==1
        else:
            focal = (1.0 - pt) ** gamma
        # Lane-wise accumulate; the single cross-lane reduce happens at the end.
        acc_ref[...] -= focal * logpt

    @pl.when(step == pl.num_programs(1) - 1)
    def _finalize():
        out_ref[...] = jnp.sum(acc_ref[...]).reshape(1, 1, 1)


def focal_loss_semi(log_alpha_mask, segmentations, label, gamma=6,
                    block_frames=None, target_block_bytes=None):
    """Pallas implementation of FocalLoss_semi.forward.

    log_alpha_mask : (B, T, S, H, W, 1) float (f32 or bf16), log-probs over S slots
    segmentations  : (B, T, H, W)        int, values in [0, S)
    label          : (B, T)              int, frame is counted iff != 0
    returns        : (1,) float32
    """
    B, T, S, H, W, _ = log_alpha_mask.shape
    N = B * T
    P = H * W

    # --- device-dependent budgets --------------------------------------------
    kind = ""
    try:
        devs = jax.devices()
        if devs:
            kind = str(devs[0].device_kind).lower()
    except Exception:
        kind = ""
    is_old = any(t in kind for t in ("v2", "v3"))
    is_big_vmem = any(t in kind for t in ("v4", "v5", "v6"))     # 128 MiB VMEM parts
    has_bf16_vpu = not any(t in kind for t in ("v2", "v3", "v4", "v5"))
    if is_old:
        vmem_limit_bytes, default_target = 12 << 20, 1 << 20
    elif is_big_vmem:
        vmem_limit_bytes, default_target = 64 << 20, 8 << 20
    else:  # v7x (64 MiB VMEM per core) or unknown: stay conservative
        vmem_limit_bytes, default_target = 48 << 20, 4 << 20
    if target_block_bytes is None:
        target_block_bytes = default_target
    vmem_budget = int(vmem_limit_bytes * 0.8)

    # --- x: squeeze + flatten pixels; keep native dtype in HBM ---------------
    x = jnp.squeeze(log_alpha_mask, axis=5).reshape(N, S, P)
    if x.dtype not in (jnp.float32, jnp.bfloat16):
        x = x.astype(jnp.float32)
    sel_bf16 = bool(x.dtype == jnp.bfloat16) and has_bf16_vpu

    # --- gt: reshape only (no wrapper HBM pass when already int32) -----------
    gt = segmentations.reshape(N, 1, P)
    if gt.dtype != jnp.int32:
        gt = gt.astype(jnp.int32)

    lab = label.reshape(N)
    valid_frame = lab != 0

    # --- choose frames-per-block F (x tile ~ target bytes, fits VMEM) --------
    x_itemsize = jnp.dtype(x.dtype).itemsize
    x_bpf = S * P * x_itemsize                       # HBM bytes of x per frame
    sub = 16 if x.dtype == jnp.bfloat16 else 8
    s_vmem = ((S + sub - 1) // sub) * sub            # sublane-padded S in VMEM

    def _vmem_est(f):
        xb = 2 * f * s_vmem * P * x_itemsize                       # x double buffer
        gb = 2 * f * 8 * P * 4                                     # gt (f,1,P) i32 (sublane pad)
        vb = 2 * ((f + 7) // 8) * 8 * 128 * 4                      # valid (1,f,1) i32
        ab = f * P * 4 + 8 * (((P + 127) // 128) * 128) * 4        # acc + cls scratch
        tmp = f * s_vmem * P * 4                                   # elementwise f32 temps
        return xb + gb + vb + ab + tmp + (2 << 20)                 # + slack

    cap = max(1, min(N, target_block_bytes // max(x_bpf, 1)))
    if block_frames is not None:
        cap = max(1, min(cap, int(block_frames)))
    while cap > 1 and _vmem_est(cap) > vmem_budget:
        cap -= 1

    F = 1
    for f in range(cap, 0, -1):                      # largest divisor of N <= cap
        if N % f == 0:
            F = f
            break
    pad_frames = 0
    if cap > 1 and F * 8 < cap:
        # Divisor-hostile N (e.g. prime): tiny blocks would be dominated by the
        # ~0.35 us per-step overhead -> pad the frame axis once instead.
        F = cap
        pad_frames = (-N) % F

    if pad_frames:
        x = jnp.pad(x, ((0, pad_frames), (0, 0), (0, 0)))
        gt = jnp.pad(gt, ((0, pad_frames), (0, 0), (0, 0)))
        valid_p = jnp.pad(valid_frame, (0, pad_frames))
    else:
        valid_p = valid_frame
    Np = N + pad_frames
    NB = Np // F
    valid3 = valid_p.astype(jnp.int32).reshape(NB, F, 1)

    # --- block-level compaction, split across the 2-core parallel axis -------
    block_valid = valid_p.reshape(NB, F).any(axis=1)
    nvb = jnp.sum(block_valid).astype(jnp.int32)
    order = jnp.argsort(jnp.logical_not(block_valid).astype(jnp.int32)).astype(jnp.int32)
    NBH = (NB + 1) // 2
    nvb0 = (nvb + 1) // 2
    nvb1 = nvb - nvb0
    j_idx = jnp.arange(NBH, dtype=jnp.int32)
    src0 = jnp.minimum(j_idx, jnp.maximum(nvb0 - 1, 0))
    src1 = jnp.minimum(nvb0 + jnp.minimum(j_idx, jnp.maximum(nvb1 - 1, 0)), NB - 1)
    bidx = jnp.stack([order[src0], order[src1]], axis=0).astype(jnp.int32)   # (2, NBH)
    nvb_arr = jnp.stack([nvb0, nvb1]).astype(jnp.int32)                      # (2,)

    partials = pl.pallas_call(
        functools.partial(_focal_kernel, gamma=gamma, select_in_bf16=sel_bf16),
        out_shape=jax.ShapeDtypeStruct((2, 1, 1), jnp.float32),
        grid_spec=pltpu.PrefetchScalarGridSpec(
            num_scalar_prefetch=2,
            grid=(2, NBH),
            in_specs=[
                pl.BlockSpec((F, S, P), lambda i, j, b, n: (b[i, j], 0, 0)),
                pl.BlockSpec((F, 1, P), lambda i, j, b, n: (b[i, j], 0, 0)),
                pl.BlockSpec((1, F, 1), lambda i, j, b, n: (b[i, j], 0, 0)),
            ],
            out_specs=pl.BlockSpec((1, 1, 1), lambda i, j, b, n: (i, 0, 0)),
            scratch_shapes=[pltpu.VMEM((F, P), jnp.float32),
                            pltpu.VMEM((S, P), jnp.int32)],
        ),
        compiler_params=pltpu.CompilerParams(
            dimension_semantics=("parallel", "arbitrary"),
            vmem_limit_bytes=vmem_limit_bytes,
        ),
    )(bidx, nvb_arr, x, gt, valid3)

    # Matches the reference: if every label is 0 this divides by zero (NaN),
    # same as the PyTorch module.
    cnt = jnp.sum(valid_frame).astype(jnp.float32)
    return (jnp.sum(partials) / cnt).reshape(1)


def _reference(log_alpha_mask, segmentations, label, gamma=6):
    """Pure-JAX reference mirroring the PyTorch per-frame loop."""
    B, T, S, H, W, _ = log_alpha_mask.shape
    N = B * T
    x = jnp.squeeze(log_alpha_mask, axis=5).reshape(N, S, H * W).astype(jnp.float32)
    gt = segmentations.reshape(N, H * W).astype(jnp.int32)
    lab = label.reshape(N)
    logpt = jnp.take_along_axis(x, gt[:, None, :], axis=1)[:, 0, :]   # (N, P)
    pt = jnp.exp(logpt)
    per_frame = jnp.sum(-((1.0 - pt) ** gamma) * logpt, axis=-1)
    mask = (lab != 0).astype(jnp.float32)
    return jnp.array([jnp.sum(per_frame * mask) / jnp.sum(mask)])


if __name__ == "__main__":
    key = jax.random.PRNGKey(0)
    k1, k2, k3, k4, k5, k6 = jax.random.split(key, 6)

    # --- Test 1: f32 input, one block covers all frames ----------------------
    B, T, S, H, W = 2, 4, 8, 16, 16
    logits = jax.random.normal(k1, (B, T, S, H, W, 1), dtype=jnp.float32)
    log_alpha_mask = jax.nn.log_softmax(logits, axis=2)
    segmentations = jax.random.randint(k2, (B, T, H, W), 0, S, dtype=jnp.int32)
    label = jnp.array([[1, 0, 2, 1], [0, 1, 1, 1]], dtype=jnp.int32)
    out = jax.block_until_ready(
        focal_loss_semi(log_alpha_mask, segmentations, label, gamma=6))
    ref = _reference(log_alpha_mask, segmentations, label, gamma=6)
    assert out.shape == (1,)
    assert jnp.allclose(out, ref, rtol=1e-5, atol=1e-4), (out, ref)

    # --- Test 2: bf16 storage, S not a multiple of 8, multiple blocks --------
    B2, T2, S2, H2, W2 = 2, 8, 5, 16, 16
    logits2 = jax.random.normal(k3, (B2, T2, S2, H2, W2, 1), dtype=jnp.float32)
    lam2 = jax.nn.log_softmax(logits2, axis=2).astype(jnp.bfloat16)
    seg2 = jax.random.randint(k4, (B2, T2, H2, W2), 0, S2, dtype=jnp.int32)
    lab2 = (jnp.arange(B2 * T2, dtype=jnp.int32) % 3).reshape(B2, T2)
    out2 = jax.block_until_ready(
        focal_loss_semi(lam2, seg2, lab2, gamma=6, block_frames=4))
    ref2 = _reference(lam2, seg2, lab2, gamma=6)
    assert out2.shape == (1,)
    assert jnp.allclose(out2, ref2, rtol=1e-3, atol=1e-3), (out2, ref2)

    # --- Test 3: odd valid-block count + a fully-dead block (skip path) ------
    B3, T3, S3, H3, W3 = 1, 12, 6, 16, 16
    logits3 = jax.random.normal(k5, (B3, T3, S3, H3, W3, 1), dtype=jnp.float32)
    lam3 = jax.nn.log_softmax(logits3, axis=2)
    seg3 = jax.random.randint(k6, (B3, T3, H3, W3), 0, S3, dtype=jnp.int32)
    lab3 = jnp.array([[1, 1, 0, 1, 0, 0, 0, 0, 2, 0, 1, 1]], dtype=jnp.int32)
    out3 = jax.block_until_ready(
        focal_loss_semi(lam3, seg3, lab3, gamma=6, block_frames=4))
    ref3 = _reference(lam3, seg3, lab3, gamma=6)
    assert out3.shape == (1,)
    assert jnp.allclose(out3, ref3, rtol=1e-5, atol=1e-4), (out3, ref3)

    print("KERNEL_OK")
</pallas_src>

<mosaic_0001>
module attributes {stable_mosaic.version = 11 : i64} {
  func.func @_focal_kernel(%arg0: i32, %arg1: i32, %arg2: memref<2x1xi32, #tpu.memory_space<smem>>, %arg3: memref<2xi32, #tpu.memory_space<smem>>, %arg4: memref<8x8x256xf32, #tpu.memory_space<vmem>>, %arg5: memref<8x1x256xi32, #tpu.memory_space<vmem>>, %arg6: memref<1x8x1xi32, #tpu.memory_space<vmem>>, %arg7: memref<1x1x1xf32, #tpu.memory_space<vmem>>, %arg8: memref<8x256xf32, #tpu.memory_space<vmem>>, %arg9: memref<8x256xi32, #tpu.memory_space<vmem>>) attributes {dimension_semantics = [#tpu.dimension_semantics<parallel>, #tpu.dimension_semantics<arbitrary>], iteration_bounds = array<i64: 2, 1>, scalar_prefetch = 2 : i64, scratch_operands = 2 : i64, tpu.core_type = #tpu.core_type<tc>, window_params = [{transform_indices = @transform_0, window_bounds = array<i64: 8, 8, 256>}, {transform_indices = @transform_1, window_bounds = array<i64: 8, 1, 256>}, {transform_indices = @transform_2, window_bounds = array<i64: 1, 8, 1>}, {transform_indices = @transform_3, window_bounds = array<i64: 1, 1, 1>}]} {
    %c0_i32 = arith.constant 0 : i32
    %0 = arith.cmpi eq, %arg1, %c0_i32 : i32
    %1 = arith.extui %0 : i1 to i32
    %c0_i32_0 = arith.constant 0 : i32
    %2 = arith.cmpi ne, %1, %c0_i32_0 : i32
    scf.if %2 {
      %cst = arith.constant 0.000000e+00 : f32
      %11 = vector.broadcast %cst : f32 to vector<8x256xf32>
      %c0 = arith.constant 0 : index
      %c0_4 = arith.constant 0 : index
      %12 = vector.load %arg8[%c0, %c0_4] : memref<8x256xf32, #tpu.memory_space<vmem>>, vector<8x256xf32>
      tpu.vector_store %arg8[%c0, %c0_4], %11 {strides = array<i32>} : memref<8x256xf32, #tpu.memory_space<vmem>>, vector<8x256xf32>,
      %cst_5 = arith.constant 0.000000e+00 : f32
      %13 = vector.broadcast %cst_5 : f32 to vector<1x1x1xf32>
      %c0_6 = arith.constant 0 : index
      %c0_7 = arith.constant 0 : index
      %c0_8 = arith.constant 0 : index
      %14 = vector.load %arg7[%c0_6, %c0_7, %c0_8] : memref<1x1x1xf32, #tpu.memory_space<vmem>>, vector<1x1x1xf32>
      tpu.vector_store %arg7[%c0_6, %c0_7, %c0_8], %13 {strides = array<i32>} : memref<1x1x1xf32, #tpu.memory_space<vmem>>, vector<1x1x1xf32>,
      %15 = tpu.iota {dimensions = array<i32: 0>} : vector<8x256xi32>
      %c0_9 = arith.constant 0 : index
      %c0_10 = arith.constant 0 : index
      %16 = vector.load %arg9[%c0_9, %c0_10] : memref<8x256xi32, #tpu.memory_space<vmem>>, vector<8x256xi32>
      tpu.vector_store %arg9[%c0_9, %c0_10], %15 {strides = array<i32>} : memref<8x256xi32, #tpu.memory_space<vmem>>, vector<8x256xi32>,
    } else {
    }
    %3 = arith.index_cast %arg0 : i32 to index
    %4 = memref.load %arg3[%3] : memref<2xi32, #tpu.memory_space<smem>>
    %5 = arith.cmpi slt, %arg1, %4 : i32
    %6 = arith.extui %5 : i1 to i32
    %c0_i32_1 = arith.constant 0 : i32
    %7 = arith.cmpi ne, %6, %c0_i32_1 : i32
    scf.if %7 {
      %c0 = arith.constant 0 : index
      %c0_4 = arith.constant 0 : index
      %c0_5 = arith.constant 0 : index
      %11 = vector.load %arg4[%c0, %c0_4, %c0_5] : memref<8x8x256xf32, #tpu.memory_space<vmem>>, vector<8x8x256xf32>
      %c0_6 = arith.constant 0 : index
      %c0_7 = arith.constant 0 : index
      %c0_8 = arith.constant 0 : index
      %12 = vector.load %arg5[%c0_6, %c0_7, %c0_8] : memref<8x1x256xi32, #tpu.memory_space<vmem>>, vector<8x1x256xi32>
      %c0_9 = arith.constant 0 : index
      %c0_10 = arith.constant 0 : index
      %13 = vector.load %arg9[%c0_9, %c0_10] : memref<8x256xi32, #tpu.memory_space<vmem>>, vector<8x256xi32>
      %14 = vector.shape_cast %13 : vector<8x256xi32> to vector<1x8x256xi32>
      %15 = vector.broadcast %14 : vector<1x8x256xi32> to vector<8x8x256xi32>
      %16 = vector.broadcast %12 : vector<8x1x256xi32> to vector<8x8x256xi32>
      %17 = arith.cmpi eq, %15, %16 : vector<8x8x256xi32>
      %cst = arith.constant 0.000000e+00 : f32
      %18 = vector.broadcast %cst : f32 to vector<8x8x256xf32>
      %19 = arith.select %17, %11, %18 : vector<8x8x256xi1>, vector<8x8x256xf32>
      %cst_11 = arith.constant dense<0.000000e+00> : vector<8x256xf32>
      %20 = vector.multi_reduction <add>, %19, %cst_11 [1] : vector<8x8x256xf32> to vector<8x256xf32>
      %c0_12 = arith.constant 0 : index
      %c0_13 = arith.constant 0 : index
      %c0_14 = arith.constant 0 : index
      %21 = vector.load %arg6[%c0_12, %c0_13, %c0_14] : memref<1x8x1xi32, #tpu.memory_space<vmem>>, vector<1x8x1xi32>
      %22 = vector.shape_cast %21 : vector<1x8x1xi32> to vector<8x1xi32>
      %c0_i32_15 = arith.constant 0 : i32
      %23 = vector.broadcast %c0_i32_15 : i32 to vector<8x1xi32>
      %24 = arith.cmpi ne, %22, %23 : vector<8x1xi32>
      %cst_16 = arith.constant 0.000000e+00 : f32
      %25 = vector.shape_cast %24 : vector<8x1xi1> to vector<8x1xi1>
      %26 = vector.broadcast %25 : vector<8x1xi1> to vector<8x256xi1>
      %27 = vector.broadcast %cst_16 : f32 to vector<8x256xf32>
      %28 = arith.select %26, %20, %27 : vector<8x256xi1>, vector<8x256xf32>
      %29 = math.exp %28 : vector<8x256xf32>
      %cst_17 = arith.constant 1.000000e+00 : f32
      %30 = vector.broadcast %cst_17 : f32 to vector<8x256xf32>
      %31 = arith.subf %30, %29 : vector<8x256xf32>
      %32 = arith.mulf %31, %31 : vector<8x256xf32>
      %33 = arith.mulf %32, %32 : vector<8x256xf32>
      %34 = arith.mulf %32, %33 : vector<8x256xf32>
      %c0_18 = arith.constant 0 : index
      %c0_19 = arith.constant 0 : index
      %35 = vector.load %arg8[%c0_18, %c0_19] : memref<8x256xf32, #tpu.memory_space<vmem>>, vector<8x256xf32>
      %36 = arith.mulf %34, %28 : vector<8x256xf32>
      %37 = arith.subf %35, %36 : vector<8x256xf32>
      %c0_20 = arith.constant 0 : index
      %c0_21 = arith.constant 0 : index
      %38 = vector.load %arg8[%c0_20, %c0_21] : memref<8x256xf32, #tpu.memory_space<vmem>>, vector<8x256xf32>
      tpu.vector_store %arg8[%c0_20, %c0_21], %37 {strides = array<i32>} : memref<8x256xf32, #tpu.memory_space<vmem>>, vector<8x256xf32>,
    } else {
    }
    %c0_i32_2 = arith.constant 0 : i32
    %8 = arith.cmpi eq, %arg1, %c0_i32_2 : i32
    %9 = arith.extui %8 : i1 to i32
    %c0_i32_3 = arith.constant 0 : i32
    %10 = arith.cmpi ne, %9, %c0_i32_3 : i32
    scf.if %10 {
      %c0 = arith.constant 0 : index
      %c0_4 = arith.constant 0 : index
      %11 = vector.load %arg8[%c0, %c0_4] : memref<8x256xf32, #tpu.memory_space<vmem>>, vector<8x256xf32>
      %12 = vector.shape_cast %11 : vector<8x256xf32> to vector<1x8x256xf32>
      %cst = arith.constant dense<0.000000e+00> : vector<1xf32>
      %13 = vector.multi_reduction <add>, %12, %cst [1, 2] : vector<1x8x256xf32> to vector<1xf32>
      %14 = vector.shape_cast %13 : vector<1xf32> to vector<1x1x1xf32>
      %15 = vector.extract %14[0, 0, 0] : f32 from vector<1x1x1xf32>
      %16 = vector.broadcast %15 : f32 to vector<1x1x1xf32>
      %c0_5 = arith.constant 0 : index
      %c0_6 = arith.constant 0 : index
      %c0_7 = arith.constant 0 : index
      %17 = vector.load %arg7[%c0_5, %c0_6, %c0_7] : memref<1x1x1xf32, #tpu.memory_space<vmem>>, vector<1x1x1xf32>
      tpu.vector_store %arg7[%c0_5, %c0_6, %c0_7], %16 {strides = array<i32>} : memref<1x1x1xf32, #tpu.memory_space<vmem>>, vector<1x1x1xf32>,
    } else {
    }
    return
  }
  func.func @transform_0(%arg0: i32, %arg1: i32, %arg2: memref<2x1xi32, #tpu.memory_space<smem>>, %arg3: memref<2xi32, #tpu.memory_space<smem>>) -> (i32, i32, i32) {
    %0 = arith.index_cast %arg0 : i32 to index
    %1 = arith.index_cast %arg1 : i32 to index
    %2 = memref.load %arg2[%0, %1] : memref<2x1xi32, #tpu.memory_space<smem>>
    %c0_i32 = arith.constant 0 : i32
    %c0_i32_0 = arith.constant 0 : i32
    %c0_i32_1 = arith.constant 0 : i32
    return %2, %c0_i32, %c0_i32_0 : i32, i32, i32
  }
  func.func @transform_1(%arg0: i32, %arg1: i32, %arg2: memref<2x1xi32, #tpu.memory_space<smem>>, %arg3: memref<2xi32, #tpu.memory_space<smem>>) -> (i32, i32, i32) {
    %0 = arith.index_cast %arg0 : i32 to index
    %1 = arith.index_cast %arg1 : i32 to index
    %2 = memref.load %arg2[%0, %1] : memref<2x1xi32, #tpu.memory_space<smem>>
    %c0_i32 = arith.constant 0 : i32
    %c0_i32_0 = arith.constant 0 : i32
    %c0_i32_1 = arith.constant 0 : i32
    return %2, %c0_i32, %c0_i32_0 : i32, i32, i32
  }
  func.func @transform_2(%arg0: i32, %arg1: i32, %arg2: memref<2x1xi32, #tpu.memory_space<smem>>, %arg3: memref<2xi32, #tpu.memory_space<smem>>) -> (i32, i32, i32) {
    %0 = arith.index_cast %arg0 : i32 to index
    %1 = arith.index_cast %arg1 : i32 to index
    %2 = memref.load %arg2[%0, %1] : memref<2x1xi32, #tpu.memory_space<smem>>
    %c0_i32 = arith.constant 0 : i32
    %c0_i32_0 = arith.constant 0 : i32
    %c0_i32_1 = arith.constant 0 : i32
    return %2, %c0_i32, %c0_i32_0 : i32, i32, i32
  }
  func.func @transform_3(%arg0: i32, %arg1: i32, %arg2: memref<2x1xi32, #tpu.memory_space<smem>>, %arg3: memref<2xi32, #tpu.memory_space<smem>>) -> (i32, i32, i32) {
    %c0_i32 = arith.constant 0 : i32
    %c0_i32_0 = arith.constant 0 : i32
    %c0_i32_1 = arith.constant 0 : i32
    return %arg0, %c0_i32, %c0_i32_0 : i32, i32, i32
  }
}

</mosaic_0001>

<bundles_post_ra>
// kernel: tpu_custom_call.1
= control target key start
LH: loop header
LB: loop body
LE: loop exit
PB: predicated region body
PF: predicated region fallthrough
CT: control target
= control target key end

     0   :  { %s1077_s24 = smov [#allocation5]   ;;  %s1078_s25 = smov [#allocation6]   ;;  %s1460_s0 = inlined_call_operand.vmem [shape: s32[2,1], index: 0, kind: input, shape index: {}]   ;;  %s1461_s2 = inlined_call_operand.hbm [shape: f32[8,8,256], index: 2, kind: input, shape index: {}]   ;;  %s1462_s3 = inlined_call_operand.hbm [shape: s32[8,1,256], index: 3, kind: input, shape index: {}]   ;;  %s1463_s4 = inlined_call_operand.vmem [shape: s32[1,8,1], index: 4, kind: input, shape index: {}]   ;;  %s1464_s5 = inlined_call_operand.vmem [shape: f32[2,1,1], index: 5, kind: output, shape index: {}]   ;;  %s1465_s1 = inlined_call_operand.vmem [shape: s32[2], index: 1, kind: input, shape index: {}]  }
   0x1   :  { %s11_s20 = sshll.u32 %s1460_s0, 4  ;;  %s16_s23 = sshll.u32 %s1465_s1, 4  ;;  %s12_s20 = int_to_ptr.vmem [resolvable:$true] %s11_s20  ;;  %s17_s23 = int_to_ptr.vmem [resolvable:$true] %s16_s23 }
   0x2   :  { %14 = dma.vmem_to_smem %s12_s20, 32, %s1077_s24, [#allocation4] }
   0x3   :  { %19 = dma.vmem_to_smem %s17_s23, 16, %s1078_s25, [#allocation4] }
   0x4   :  { %1031 = dma.done.wait [#allocation4], 48 }
   0x5   :  { %1032 = vsyncadd [#allocation4], 4294967248 }
   0x6   :  { %22 = sfence }
   0x7   :  { %23 = vsyncpa [#allocation8], 0 }
   0x8   :  { %25 = vsyncpa [#allocation8 + $0x1], 0 }
   0x9   :  { %26 = vsyncpa [#allocation10], 0 }
   0xa   :  { %28 = vsyncpa [#allocation10 + $0x1], 0  ;;  %s1121_s26 = smov 0   ;;  %s1123_s0 = smov 0  }
   0xb   :  { %s1125_s27 = smov 0   ;;  %s1127_s1 = smov 0  }
   0xc   :  { %s1129_s28 = smov 0   ;;  %s1131_s29 = smov 0  }
   0xd   :  { %s1133_s30 = smov 0   ;;  %s1135_s6 = smov 0  }
   0xe   :  { %s1137_s7 = smov 0  }
   0xf LB: > { %1470 = sst [smem:[#allocation18_spill]] %s1071_s6  ;;  %s773_s8 = sadd.s32 4294967295, %s1075_s7   ;;  %s1075_s7 = sphi %s1137_s7, %s34_s7   ;;  %s1071_s6 = sphi %s1135_s6, %s1512_s6   ;;  %s1067_s30 = sphi %s1133_s30, %s1511_s30   ;;  %s1063_s29 = sphi %s1131_s29, %s1518_s29   ;;  %s1059_s28 = sphi %s1129_s28, %s1517_s28   ;;  %s1055_s1 = sphi %s1127_s1, %s1516_s1   ;;  %s1051_s27 = sphi %s1125_s27, %s1515_s27   ;;  %s1047_s0 = sphi %s1123_s0, %s1514_s0   ;;  %s1043_s26 = sphi %s1121_s26, %s1513_s26  }
  0x10   : > { %s46_s9 = sadd.s32 1, %s1071_s6  ;;  %s1167_s10 = sshll.u32 %s1071_s6, 7 }
  0x11   : > { %p48_p0 = scmp.ge.s32.totalorder %s46_s9, 2  ;;  %s57_s11 = sld [smem:[#allocation5 + %s1167_s10]] }
  0x12   : > { %s69_s12 = sadd.s32 1, %s1063_s29  ;;  %p76_p1 = scmp.ne.s32.totalorder %s1063_s29, %s1059_s28 }
  0x13   : > { %s1520_s9 = smov (%p48_p0, %s46_s9), 0  ;;  %p77_p2 = scmp.eq.s32.totalorder %s1075_s7, 0 }
  0x14   : > { %1471 = sst [smem:[#allocation19_spill]] %s1520_s9  ;;  %s776_s13 = sshll.u32 %s1520_s9, 7 }
  0x15   : > { %p82_p3 = scmp.ne.s32.totalorder %s1059_s28, %s1055_s1  ;;  %s65_s14 = sld [smem:[#allocation5 + %s776_s13]] }
  0x16   : > { %p1180_p4 = por %p77_p2, %p76_p1  ;;  %p1184_p5 = scmp.eq.s32.totalorder %s773_s8, 0 }
  0x17   : > { %s99_s17 = sld [smem:[#allocation5 + %s1167_s10]]  ;;  %p1469_p7 = scmp.lt.s32.totalorder %s1075_s7, 2 }
  0x18   : > { %s107_s18 = sld [smem:[#allocation5 + %s776_s13]]  ;;  %p1191_p6 = por %p1184_p5, %p82_p3 }
  0x19   : > { %s216_s20 = sand.u32 1, %s1063_s29   ;;  %p1216_p9 = pnand %p1469_p7, %p1180_p4 }
  0x1a   : > { %s783_s21 = sshll.u32 %s216_s20, 7  ;;  %p792_p10 = scmp.ge.s32.totalorder %s1075_s7, 1 }
  0x1b   : > { %s66_s22 = ssub.s32 %s57_s11, %s65_s14  ;;  %s220_s23 = scalar_lea.vmem [#allocation7], %s783_s21 }
  0x1c   : > { %p67_p8 = scmp.eq.s32.totalorder %s66_s22, 0  ;;  %s1197_s24 = sshll.u32 %s220_s23, 4 }
  0x1d   : > { %1475 = sst [smem:[#allocation20_spill]] %s1197_s24  ;;  %p298_p11 = scmp.lt.s32.totalorder %s1075_s7, 3 }
  0x1e   : > { %s806_s25 = scalar_select %p1180_p4, [#allocation5], [#allocation11] }
  0x1f   : > { %s1202_s1 = scalar_select %p67_p8, %s1063_s29, %s69_s12  }
  0x20   : > { %s807_s8 = scalar_select %p1180_p4, %s1167_s10, 0 }
  0x21   : > { %1476 = sst [smem:[#allocation21_spill]] %s1202_s1  ;;  %s1522_s25 = smov (!%p1469_p7, %s806_s25), [#allocation13] }
  0x22   : > { %s1524_s8 = smov (!%p1469_p7, %s807_s8), 0  ;;  %p1222_p12 = pnand %p792_p10, %p298_p11 }
  0x23   : > { %s228_s13 = sld [smem:[%s1522_s25 + %s1524_s8]]  ;;  %s108_s21 = ssub.s32 %s99_s17, %s107_s18 }
  0x24   : > { %p1229_p13 = scmp.eq.s32.totalorder %s108_s21, 0  ;;  %s111_s6 = sadd.s32 1, %s1051_s27 }
  0x25   : > { %s217_s25 = scalar_lea.sflag [#allocation8], %s216_s20  ;;  %p939_p3 = pneg %p1216_p9 }
  0x29   : > { %s802_s14 = sshll.u32 %s228_s13, 7  ;;  %s942_s13 = scalar_lea.hbm %s1461_s2, 128 }
  0x2a   : > { %s234_s24 = scalar_lea.hbm %s1461_s2, %s802_s14 }
  0x2b   : > { %s235_s9 = sshll.u32 %s234_s24, 4  ;;  %s236_s9 = int_to_ptr.hbm [resolvable:$true] %s235_s9 }
  0x2c   : > { %s935_s8 = sshra.s32 %s236_s9, 4  ;;  %s936_s8 = int_to_ptr.hbm [resolvable:$true] %s935_s8 }
  0x2d   : > { %s937_s1 = scalar_lea.hbm %s936_s8, 128  ;;  %p943_p10 = scmp.lt.s32.totalorder %s936_s8, %s1461_s2 }
  0x2e   : > { %p938_p1 = scmp.ne.s32.totalorder %s936_s8, %s937_s1  ;;  %p944_p11 = scmp.lt.s32.totalorder %s942_s13, %s937_s1 }
  0x30   : > { %p940_p4 = pnand %p939_p3, %p938_p1  ;;  %p945_p7 = por %p944_p11, %p943_p10 }
  0x32   : > { %p941_p8 = pneg %p940_p4 }
  0x34   : > { %p946_p0 = pnand %p945_p7, %p941_p8 }
  0x36   : > { %949 = shalt.err (!%p946_p0)
}
  0x37   : > { %s1079_s20 = smov 256   ;;  %s1480_s24 = sld [smem:[#allocation20_spill]] }
  0x38   : > { %s1080_s1 = smov 16   ;;  %p124_p7 = scmp.ne.s32.totalorder %s1047_s0, %s1043_s26 }
  0x39   : > { %s1251_s23 = scalar_select %p1229_p13, %s1051_s27, %s111_s6  }
  0x3a   : > { %p1482_p0 = scmp.ne.s32.totalorder %s1051_s27, %s1047_s0  ;;  %s247_s8 = sand.u32 1, %s1051_s27  }
  0x3b   : > { %p1263_p3 = por %p124_p7, %p1184_p5  ;;  %s788_s18 = sshll.u32 %s247_s8, 4 }
  0x3c   : > { %p120_p1 = por %p1482_p0, %p77_p2  ;;  %p1484_p4 = scmp.lt.s32.totalorder %s1075_s7, 2 }
  0x3d   : > { %s1481_s22 = int_to_ptr.vmem [resolvable:$true] %s1480_s24  ;;  %s251_s6 = scalar_lea.vmem [#allocation9], %s788_s18 }
  0x3e   : > { %819 = dma.hbm_to_vmem [thread:$0]  (!%p1216_p9), %s236_s9, 2048, %s1481_s22, %s217_s25, %s1079_s20, %s1079_s20, %s1080_s1  }
  0x3f   : > { %p1269_p8 = pnand %p1484_p4, %p120_p1  ;;  %s1526_s10 = smov (!%p120_p1, %s1167_s10), 0 }
  0x40   : > { %s809_s9 = scalar_select %p120_p1, [#allocation5], [#allocation12] }
  0x41   : > { %p1486_p9 = pmov %p1484_p4  ;;  %p1487_p13 = pmov %p1484_p4 }
  0x42   : > { %s267_s16 = sshll.u32 %s251_s6, 4  ;;  %s248_s20 = scalar_lea.sflag [#allocation10], %s247_s8  ;;  %s268_s16 = int_to_ptr.vmem [resolvable:$true] %s267_s16 }
  0x43   : > { %s1528_s9 = smov (!%p1486_p9, %s809_s9), [#allocation14]  ;;  %s1530_s10 = smov (!%p1487_p13, %s1526_s10), 0 }
  0x44   : > { %s259_s26 = sld [smem:[%s1528_s9 + %s1530_s10]]  ;;  %p969_p5 = pneg %p1269_p8 }
  0x45   : > { %s972_s18 = scalar_lea.hbm %s1462_s3, 16 }
  0x4a   : > { %s803_s11 = sshll.u32 %s259_s26, 4 }
  0x4b   : > { %s264_s14 = scalar_lea.hbm %s1462_s3, %s803_s11 }
  0x4c   : > { %s265_s21 = sshll.u32 %s264_s14, 4  ;;  %s266_s21 = int_to_ptr.hbm [resolvable:$true] %s265_s21 }
  0x4d   : > { %s965_s24 = sshra.s32 %s266_s21, 4  ;;  %s966_s24 = int_to_ptr.hbm [resolvable:$true] %s965_s24 }
  0x4e   : > { %s967_s1 = scalar_lea.hbm %s966_s24, 16  ;;  %p973_p7 = scmp.lt.s32.totalorder %s966_s24, %s1462_s3 }
  0x4f   : > { %p968_p2 = scmp.ne.s32.totalorder %s966_s24, %s967_s1  ;;  %p974_p0 = scmp.lt.s32.totalorder %s972_s18, %s967_s1 }
  0x51   : > { %p970_p10 = pnand %p969_p5, %p968_p2  ;;  %p975_p1 = por %p974_p0, %p973_p7 }
  0x53   : > { %p971_p11 = pneg %p970_p10 }
  0x55   : > { %p976_p4 = pnand %p975_p1, %p971_p11 }
  0x57   : > { %979 = shalt.err (!%p976_p4)
}
  0x58   : > { %s1081_s8 = smov 32   ;;  %s1082_s6 = smov 2  }
  0x59   : > { %824 = dma.hbm_to_vmem [thread:$0]  (!%p1269_p8), %s266_s21, 256, %s268_s16, %s248_s20, %s1081_s8, %s1081_s8, %s1082_s6  }
  0x5a   : > { %302 = sbr.rel (%p1222_p12) target bundleno = 447 (0x1bf), region = 32  ;;  %s304_s11 = sand.u32 (!%p1222_p12), 1, %s1059_s28  }
  0x5b   : > { %s793_s15 = sshll.u32 (!%p1222_p12), %s304_s11, 7  ;;  %s305_s25 = scalar_lea.sflag (!%p1222_p12), [#allocation8], %s304_s11 }
  0x5c   : > { %s1294_s14 = scalar_lea.vmem (!%p1222_p12), [#allocation7], %s793_s15 }
  0x5f   : > { %1034 = dma.done.wait (%p1191_p6), %s305_s25, 2048  }
  0x60   : > { %1036 = vsyncadd (%p1191_p6), %s305_s25, 4294965248  ;;  %s314_s24 = sand.u32 1, %s1047_s0  }
  0x61   : > { %s794_s13 = sshll.u32 %s314_s24, 4  ;;  %s315_s16 = scalar_lea.sflag [#allocation10], %s314_s24 }
  0x62   : > { %s1301_s21 = scalar_lea.vmem [#allocation9], %s794_s13 }
  0x63   : > { %1038 = dma.done.wait (%p1263_p3), %s315_s16, 256  }
  0x64   : > { %1040 = vsyncadd (%p1263_p3), %s315_s16, 4294967040  ;;  %s795_s12 = sshll.u32 %s1067_s30, 7  ;;  %p395_p12 = scmp.lt.s32.totalorder %s1067_s30, 1  ;;  %v406_v0 = vlaneseq  ;;  %v1083_v1 = vmov 0.0   ;;  %vm404_vm0 = vcmask 0  }
  0x65   : > { %s382_s19 = sld [smem:[#allocation5 + %s795_s12]]  ;;  %402 = vst [vmem:[#allocation2] sm:$0xff] %v1083_v1 }
  0x66   : > { %s410_s20 = sld [smem:[#allocation6 + %s1067_s30]]  ;;  %403 = vst [vmem:[#allocation2 + $0x8] sm:$0xff] %v1083_v1  ;;  %v407_v2 = vshrl.u32 %v406_v0, 7  ;;  %s1532_s30 = smov (!%p395_p12, %s1067_s30), 1 }
  0x67   : > { %s1314_s17 = scalar_lea.vmem %s1464_s5, %s1532_s30 }
  0x68   : > { %408 = vst [vmem:[#allocation3 + $0x8] sm:$0xff] %v407_v2 }
  0x69   : > { %409 = vst [vmem:[#allocation3] sm:$0xff] %v407_v2 }
  0x6a   : > { %405 = vst.msk [vmem:[%s1314_s17] sm:$0x1] %vm404_vm0, %v1083_v1 }
  0x6b   : > { %p383_p6 = scmp.lt.s32.totalorder %s382_s19, 0 }
  0x6c   : > { %p798_p3 = scmp.le.s32.totalorder %s410_s20, 0 }
  0x6d   : > { %s1534_s19 = smov (!%p383_p6, %s382_s19), 0 }
  0x6e   : > { %s796_s22 = sshll.u32 %s1534_s19, 3  ;;  %414 = sbr.rel (%p798_p3) target bundleno = 258 (0x102), region = 48 }
  0x6f   : > { %s386_s26 = scalar_lea.vmem %s1463_s4, %s796_s22 }
  0x73   : > { %v585_v3 = vld [vmem:[%s386_s26] sm:$0xff]  ;;  %v1084_v4 = vmov 0   ;;  %v1325_v12 = vld [vmem:[#allocation3 + $0x8] sm:$0xff]  ;;  %v1327_v13 = vld [vmem:[#allocation3] sm:$0xff] }
  0x74   : > { %906 = vset.pattern.permute.xlu0 %v1084_v4  ;;  %vm586_vm1 = vcmp.ne.s32.totalorder %v585_v3, 0  ;;  %v431_v6 = vld [vmem:[%s1301_s21] sm:$0x3]  ;;  %v432_v7 = vld [vmem:[%s1301_s21 + $0x2] sm:$0x3]  ;;  %v416_v22 = vld [vmem:[%s1294_s14 + $0x8] sm:$0xff] }
  0x75   : > { %v587_v5 = vsel %vm586_vm1, 1, %v1084_v4  ;;  %v433_v8 = vld [vmem:[%s1301_s21 + $0x4] sm:$0x3]  ;;  %v434_v9 = vld [vmem:[%s1301_s21 + $0x6] sm:$0x3]  ;;  %v441_v10 = vperm.slane %v431_v6, 0 }
  0x76   : > { %589 = vperm.xlu0 %906, %v587_v5   ;;  %v442_v11 = vperm.slane %v431_v6, 1  ;;  %v443_v14 = vperm.slane %v432_v7, 0  ;;  %v444_v15 = vperm.slane %v432_v7, 1  ;;  %v445_v16 = vperm.slane %v433_v8, 0  ;;  %v435_v18 = vld [vmem:[%s1301_s21 + $0x8] sm:$0x3] }
  0x77   : > { %v446_v17 = vperm.slane %v433_v8, 1  ;;  %v447_v19 = vperm.slane %v434_v9, 0  ;;  %v448_v20 = vperm.slane %v434_v9, 1  ;;  %v415_v21 = vld [vmem:[%s1294_s14] sm:$0xff]  ;;  %vm1333_vm2 = vcmp.eq.s32.totalorder %v1325_v12, %v441_v10  ;;  %v417_v25 = vld [vmem:[%s1294_s14 + $0x10] sm:$0xff]  ;;  %v418_v29 = vld [vmem:[%s1294_s14 + $0x18] sm:$0xff] }
  0x78   : > { %vm1338_vm3 = vcmp.eq.s32.totalorder %v1327_v13, %v442_v11  ;;  %v436_v26 = vld [vmem:[%s1301_s21 + $0xa] sm:$0x3]  ;;  %v437_v27 = vld [vmem:[%s1301_s21 + $0xc] sm:$0x3]  ;;  %vm1346_vm4 = vcmp.eq.s32.totalorder %v1325_v12, %v443_v14  ;;  %v419_v30 = vld [vmem:[%s1294_s14 + $0x20] sm:$0xff]  ;;  %v449_v32 = vperm.slane %v435_v18, 0  ;;  %vm460_vm5 = vcmp.eq.s32.totalorder %v1327_v13, %v444_v15 }
  0x79   : > { %v420_v31 = vld [vmem:[%s1294_s14 + $0x28] sm:$0xff]  ;;  %vm461_vm6 = vcmp.eq.s32.totalorder %v1325_v12, %v445_v16  ;;  %vm462_vm7 = vcmp.eq.s32.totalorder %v1327_v13, %v446_v17  ;;  %v421_v33 = vld [vmem:[%s1294_s14 + $0x30] sm:$0xff]  ;;  %v422_v34 = vld [vmem:[%s1294_s14 + $0x38] sm:$0xff]  ;;  %vm463_vm8 = vcmp.eq.s32.totalorder %v1325_v12, %v447_v19  ;;  %vm464_vm9 = vcmp.eq.s32.totalorder %v1327_v13, %v448_v20 }
  0x7a   : > { %v473_v35 = vsel %vm1333_vm2, %v415_v21, 0.0  ;;  %v474_v36 = vsel %vm1338_vm3, %v416_v22, 0.0  ;;  %v438_v37 = vld [vmem:[%s1301_s21 + $0xe] sm:$0x3]  ;;  %v450_v38 = vperm.slane %v435_v18, 1  ;;  %v451_v39 = vperm.slane %v436_v26, 0 }
  0x7b   : > { %v452_v40 = vperm.slane %v436_v26, 1  ;;  %v453_v41 = vperm.slane %v437_v27, 0  ;;  %v475_v42 = vsel %vm1346_vm4, %v417_v25, 0.0  ;;  %v476_v43 = vsel %vm460_vm5, %v418_v29, 0.0  ;;  %v423_v6 = vld [vmem:[%s1294_s14 + $0x40] sm:$0xff]  ;;  %v424_v7 = vld [vmem:[%s1294_s14 + $0x48] sm:$0xff] }
  0x7c   : > { %v477_v44 = vsel %vm461_vm6, %v419_v30, 0.0  ;;  %v478_v45 = vsel %vm462_vm7, %v420_v31, 0.0  ;;  %v454_v46 = vperm.slane %v437_v27, 1  ;;  %vm1368_vm10 = vcmp.eq.s32.totalorder %v1325_v12, %v449_v32  ;;  %v425_v8 = vld [vmem:[%s1294_s14 + $0x50] sm:$0xff]  ;;  %v426_v15 = vld [vmem:[%s1294_s14 + $0x58] sm:$0xff]  ;;  %v427_v16 = vld [vmem:[%s1294_s14 + $0x60] sm:$0xff] }
  0x7d   : > { %v479_v48 = vsel %vm463_vm8, %v421_v33, 0.0  ;;  %v480_v49 = vsel %vm464_vm9, %v422_v34, 0.0  ;;  %v455_v50 = vperm.slane %v438_v37, 0  ;;  %v456_v51 = vperm.slane %v438_v37, 1  ;;  %v428_v17 = vld [vmem:[%s1294_s14 + $0x68] sm:$0xff]  ;;  %v429_v22 = vld [vmem:[%s1294_s14 + $0x70] sm:$0xff] }
  0x7e   : > { %v489_v52 = vrot.slane %v473_v35, 4  ;;  %v495_v53 = vrot.slane %v474_v36, 4  ;;  %v501_v54 = vrot.slane %v475_v42, 4  ;;  %v507_v55 = vrot.slane %v476_v43, 4  ;;  %v430_v23 = vld [vmem:[%s1294_s14 + $0x78] sm:$0xff] }
  0x7f   : > { %v513_v56 = vrot.slane %v477_v44, 4  ;;  %v519_v57 = vrot.slane %v478_v45, 4  ;;  %v525_v60 = vrot.slane %v479_v48, 4  ;;  %v531_v61 = vrot.slane %v480_v49, 4 }
  0x80   : > { %v490_v58 = vadd.f32 %v489_v52, %v473_v35  ;;  %v496_v59 = vadd.f32 %v495_v53, %v474_v36  ;;  %v502_v62 = vadd.f32 %v501_v54, %v475_v42  ;;  %v508_v63 = vadd.f32 %v507_v55, %v476_v43 }
  0x81   : > { %v514_v0 = vadd.f32 %v513_v56, %v477_v44  ;;  %v520_v1 = vadd.f32 %v519_v57, %v478_v45  ;;  %vm1373_vm11 = vcmp.eq.s32.totalorder %v1327_v13, %v450_v38  ;;  %v526_v5 = vadd.f32 %v525_v60, %v479_v48 }
  0x82   : > { %v491_v3 = vrot.slane %v490_v58, 2  ;;  %v497_v4 = vrot.slane %v496_v59, 2  ;;  %vm1381_vm12 = vcmp.eq.s32.totalorder %v1325_v12, %v451_v39  ;;  %vm1386_vm13 = vcmp.eq.s32.totalorder %v1327_v13, %v452_v40 }
  0x83   : > { %vm1391_vm14 = vcmp.eq.s32.totalorder %v1325_v12, %v453_v41  ;;  %vm1396_vm15 = vcmp.eq.s32.totalorder %v1327_v13, %v454_v46  ;;  %vm1404_vm1 = vcmp.eq.s32.totalorder %v1325_v12, %v455_v50  ;;  %vm1409_vm2 = vcmp.eq.s32.totalorder %v1327_v13, %v456_v51 }
  0x84   : > { %v503_v20 = vrot.slane %v502_v62, 2  ;;  %v532_v21 = vadd.f32 %v531_v61, %v480_v49  ;;  %v492_v24 = vadd.f32 %v491_v3, %v490_v58  ;;  %v509_v25 = vrot.slane %v508_v63, 2 }
  0x85   : > { %v515_v26 = vrot.slane %v514_v0, 2  ;;  %v521_v27 = vrot.slane %v520_v1, 2  ;;  %v481_v28 = vsel %vm1368_vm10, %v423_v6, 0.0  ;;  %v482_v12 = vsel %vm1373_vm11, %v424_v7, 0.0 }
  0x86   : > { %v498_v29 = vadd.f32 %v497_v4, %v496_v59  ;;  %v527_v30 = vrot.slane %v526_v5, 2  ;;  %v483_v13 = vsel %vm1381_vm12, %v425_v8, 0.0  ;;  %v484_v31 = vsel %vm1386_vm13, %v426_v15, 0.0 }
  0x87   : > { %v485_v32 = vsel %vm1391_vm14, %v427_v16, 0.0  ;;  %v486_v33 = vsel %vm1396_vm15, %v428_v17, 0.0  ;;  %v487_v34 = vsel %vm1404_vm1, %v429_v22, 0.0  ;;  %v488_v35 = vsel %vm1409_vm2, %v430_v23, 0.0 }
  0x88   : > { %v504_v36 = vadd.f32 %v503_v20, %v502_v62  ;;  %v533_v37 = vrot.slane %v532_v21, 2  ;;  %v493_v38 = vrot.slane %v492_v24, 1  ;;  %v510_v39 = vadd.f32 %v509_v25, %v508_v63 }
  0x89   : > { %v516_v40 = vadd.f32 %v515_v26, %v514_v0  ;;  %v522_v41 = vadd.f32 %v521_v27, %v520_v1  ;;  %v499_v42 = vrot.slane %v498_v29, 1  ;;  %v528_v43 = vadd.f32 %v527_v30, %v526_v5 }
  0x8a   : > { %v537_v44 = vrot.slane %v481_v28, 4  ;;  %v543_v45 = vrot.slane %v482_v12, 4  ;;  %v549_v46 = vrot.slane %v483_v13, 4  ;;  %v555_v47 = vrot.slane %v484_v31, 4 }
  0x8b   : > { %v561_v48 = vrot.slane %v485_v32, 4  ;;  %v567_v49 = vrot.slane %v486_v33, 4  ;;  %v534_v50 = vadd.f32 %v533_v37, %v532_v21  ;;  %v573_v53 = vrot.slane %v487_v34, 4 }
  0x8c   : > { %v538_v51 = vadd.f32 %v537_v44, %v481_v28  ;;  %v544_v52 = vadd.f32 %v543_v45, %v482_v12  ;;  %v550_v54 = vadd.f32 %v549_v46, %v483_v13  ;;  %v556_v55 = vadd.f32 %v555_v47, %v484_v31 }
  0x8d   : > { %v562_v56 = vadd.f32 %v561_v48, %v485_v32  ;;  %v579_v57 = vrot.slane %v488_v35, 4  ;;  %v568_v60 = vadd.f32 %v567_v49, %v486_v33  ;;  %v574_v61 = vadd.f32 %v573_v53, %v487_v34 }
  0x8e   : > { %v539_v58 = vrot.slane %v538_v51, 2  ;;  %v545_v59 = vrot.slane %v544_v52, 2  ;;  %v505_v62 = vrot.slane %v504_v36, 1  ;;  %v511_v63 = vrot.slane %v510_v39, 1 }
  0x8f   : > { %v551_v0 = vrot.slane %v550_v54, 2  ;;  %v557_v1 = vrot.slane %v556_v55, 2  ;;  %v517_v2 = vrot.slane %v516_v40, 1  ;;  %v523_v3 = vrot.slane %v522_v41, 1 }
  0x90   : > { %v540_v4 = vadd.f32 %v539_v58, %v538_v51  ;;  %v546_v5 = vadd.f32 %v545_v59, %v544_v52  ;;  %v529_v6 = vrot.slane %v528_v43, 1  ;;  %v535_v7 = vrot.slane %v534_v50, 1 }
  0x91   : > { %v563_v8 = vrot.slane %v562_v56, 2  ;;  %v580_v9 = vadd.f32 %v579_v57, %v488_v35  ;;  %v494_v10 = vadd.f32 %v493_v38, %v492_v24  ;;  %v500_v11 = vadd.f32 %v499_v42, %v498_v29 }
  0x92   : > { %v569_v14 = vrot.slane %v568_v60, 2  ;;  %v575_v15 = vrot.slane %v574_v61, 2  ;;  %v506_v16 = vadd.f32 %v505_v62, %v504_v36  ;;  %v512_v17 = vadd.f32 %v511_v63, %v510_v39 }
  0x93   : > { %v552_v18 = vadd.f32 %v551_v0, %v550_v54  ;;  %v558_v19 = vadd.f32 %v557_v1, %v556_v55  ;;  %v518_v20 = vadd.f32 %v517_v2, %v516_v40  ;;  %v524_v21 = vadd.f32 %v523_v3, %v522_v41 }
  0x94   : > { %v541_v22 = vrot.slane %v540_v4, 1  ;;  %v547_v23 = vrot.slane %v546_v5, 1  ;;  %v530_v25 = vadd.f32 %v529_v6, %v528_v43  ;;  %v536_v26 = vadd.f32 %v535_v7, %v534_v50 }
  0x95   : > { %v564_v27 = vadd.f32 %v563_v8, %v562_v56  ;;  %v581_v28 = vrot.slane %v580_v9, 2  ;;  %v570_v12 = vadd.f32 %v569_v14, %v568_v60  ;;  %v576_v30 = vadd.f32 %v575_v15, %v574_v61  ;;  %v645_v8 = vld [vmem:[#allocation2] sm:$0xff] }
  0x96   : > { %vm608_vm3 = vcmask 1041409   ;;  %vm610_vm4 = vcmask 1042434   ;;  %v553_v24 = vrot.slane %v552_v18, 1  ;;  %v559_v29 = vrot.slane %v558_v19, 1 }
  0x97   : > { %v609_v13 = vsel %vm608_vm3, %v506_v16, %v494_v10  ;;  %vm612_vm5 = vcmask 1043459   ;;  %v542_v31 = vadd.f32 %v541_v22, %v540_v4  ;;  %v548_v32 = vadd.f32 %v547_v23, %v546_v5 }
  0x98   : > { %v611_v33 = vsel %vm610_vm4, %v518_v20, %v609_v13  ;;  %v622_v34 = vsel %vm608_vm3, %v512_v17, %v500_v11  ;;  %v582_v35 = vadd.f32 %v581_v28, %v580_v9  ;;  %vm614_vm6 = vcmask 1044484   ;;  %v646_v9 = vld [vmem:[#allocation2 + $0x8] sm:$0xff] }
  0x99   : > { %v613_v36 = vsel %vm612_vm5, %v530_v25, %v611_v33  ;;  %v623_v37 = vsel %vm610_vm4, %v524_v21, %v622_v34  ;;  %v565_v38 = vrot.slane %v564_v27, 1  ;;  %v571_v39 = vrot.slane %v570_v12, 1 }
  0x9a   : > { %v624_v40 = vsel %vm612_vm5, %v536_v26, %v623_v37  ;;  %v554_v41 = vadd.f32 %v553_v24, %v552_v18  ;;  %v560_v42 = vadd.f32 %v559_v29, %v558_v19  ;;  %v615_v43 = vsel %vm614_vm6, %v542_v31, %v613_v36 }
  0x9b   : > { %vm616_vm7 = vcmask 1045509   ;;  %v625_v44 = vsel %vm614_vm6, %v548_v32, %v624_v40  ;;  %v577_v45 = vrot.slane %v576_v30, 1  ;;  %v583_v46 = vrot.slane %v582_v35, 1 }
  0x9c   : > { %v566_v47 = vadd.f32 %v565_v38, %v564_v27  ;;  %v572_v48 = vadd.f32 %v571_v39, %v570_v12  ;;  %v617_v49 = vsel %vm616_vm7, %v554_v41, %v615_v43  ;;  %vm618_vm8 = vcmask 1046534  }
  0x9d   : > { %v626_v50 = vsel %vm616_vm7, %v560_v42, %v625_v44  ;;  %v578_v51 = vadd.f32 %v577_v45, %v576_v30  ;;  %v584_v52 = vadd.f32 %v583_v46, %v582_v35  ;;  %vm620_vm9 = vcmask 1047559  }
  0x9e   : > { %v619_v53 = vsel %vm618_vm8, %v566_v47, %v617_v49  ;;  %v627_v54 = vsel %vm618_vm8, %v572_v48, %v626_v50 }
  0x9f   : > { %v621_v55 = vsel %vm620_vm9, %v578_v51, %v619_v53  ;;  %v628_v56 = vsel %vm620_vm9, %v584_v52, %v627_v54 }
  0xe8   : > { %v590_v57 = vpop.permute.xlu0 %589 }
  0xe9   : > { %vm591_vm10 = vcmp.eq.s32.totalorder %v590_v57, 1 }
  0xea   : > { %v631_v58 = vsel %vm591_vm10, %v621_v55, 0.0  ;;  %v632_v59 = vsel %vm591_vm10, %v628_v56, 0.0 }
  0xeb   : > { %v633_v60 = vmul.f32 1.442695, %v631_v58  ;;  %v635_v61 = vmul.f32 1.442695, %v632_v59 }
  0xed   : > { %907 = vpow2.f32 %v633_v60 }
  0xee   : > { %909 = vpow2.f32 %v635_v61 }
  0xf3   : > { %v908_v62 = vpop.eup %907 }
  0xf4   : > { %v910_v63 = vpop.eup %909  ;;  %v637_v0 = vsub.f32 1.0, %v908_v62 }
  0xf5   : > { %v638_v1 = vsub.f32 1.0, %v910_v63 }
  0xf6   : > { %v639_v2 = vmul.f32 %v637_v0, %v637_v0 }
  0xf7   : > { %v640_v3 = vmul.f32 %v638_v1, %v638_v1 }
  0xf8   : > { %v641_v4 = vmul.f32 %v639_v2, %v639_v2 }
  0xf9   : > { %v642_v5 = vmul.f32 %v640_v3, %v640_v3 }
  0xfa   : > { %v643_v6 = vmul.f32 %v641_v4, %v639_v2 }
  0xfb   : > { %v644_v7 = vmul.f32 %v642_v5, %v640_v3 }
  0xfc   : > { %v647_v10 = vmul.f32 %v643_v6, %v631_v58 }
  0xfd   : > { %v648_v11 = vmul.f32 %v644_v7, %v632_v59 }
  0xfe   : > { %v649_v14 = vsub.f32 %v645_v8, %v647_v10 }
  0xff   : > { %v650_v15 = vsub.f32 %v646_v9, %v648_v11 }
 0x100   : > { %651 = vst [vmem:[#allocation2] sm:$0xff] %v649_v14 }
 0x101   : > { %652 = vst [vmem:[#allocation2 + $0x8] sm:$0xff] %v650_v15 }
 0x102 PF:  {}
 0x107   : > { %v656_v16 = vld [vmem:[#allocation2] sm:$0xff] }
 0x108   : > { %v657_v17 = vld [vmem:[#allocation2 + $0x8] sm:$0xff] }
 0x109   : > { %v658_v18 = vadd.f32 %v657_v17, %v656_v16 }
 0x10b   : > { %659 = vadd.xlane.f32.xlu0 %v658_v18 }
 0x17e   : > { %v660_v19 = vpop.xlane.xlu0 %659 }
 0x17f   : > { %v661_v20 = vrot.slane %v660_v19, 4 }
 0x181   : > { %v662_v21 = vadd.f32 %v661_v20, %v660_v19 }
 0x183   : > { %v663_v22 = vrot.slane %v662_v21, 2 }
 0x185   : > { %v664_v23 = vadd.f32 %v663_v22, %v662_v21 }
 0x187   : > { %v665_v25 = vrot.slane %v664_v23, 1 }
 0x189   : > { %v666_v26 = vadd.f32 %v665_v25, %v664_v23 }
 0x18b   : > { %804 = vpush %v666_v26 }
 0x1bc   : > { %s805_s30 = spop %804 }
 0x1bd   : > { %v668_v27 = vstv %s805_s30 }
 0x1be   : > { %670 = vst.msk [vmem:[%s1314_s17] sm:$0x1] %vm404_vm0, %v668_v27 }
 0x1bf PF: > { %s34_s7 = sadd.s32 1, %s1075_s7   ;;  %s1510_s8 = sld [smem:[#allocation21_spill]] }
 0x1c0   : > { %p31_p8 = scmp.ge.s32.totalorder %s34_s7, 4   ;;  %s1511_s30 = sld [smem:[#allocation18_spill]] }
 0x1c1   : > { %s1512_s6 = sld [smem:[#allocation19_spill]]  ;;  %s1513_s26 = smov %s1047_s0 }
 0x1c2   : > { %s1514_s0 = smov %s1051_s27  ;;  %s1515_s27 = smov %s1251_s23 }
 0x1c3   : > { %s1516_s1 = smov %s1059_s28  ;;  %s1517_s28 = smov %s1063_s29 }
 0x1c4   :  { %33 = sbr.rel (!%p31_p8) target bundleno = 15 (0xf), region = 100 }
 0x1c5   : > { %s1518_s29 = smov %s1510_s8 }
 0x1c9   :  { %688 = vsyncpa [#allocation8], 1 }
 0x1ca   :  { %690 = vsyncpa [#allocation8 + $0x1], 1 }
 0x1cb   :  { %691 = vsyncpa [#allocation10], 1 }
 0x1cc   :  { %693 = vsyncpa [#allocation10 + $0x1], 1 }

</bundles_post_ra>
